<compile_context>
chip_gen: v6e
topology: v6e:2x2x1
jax: 0.10.0
libtpu: 0.0.40
codegen_flags: <defaults>
</compile_context>

<pallas_src>
import functools

import jax
import jax.numpy as jnp
from jax.experimental import pallas as pl
from jax.experimental.pallas import tpu as pltpu


def sdne_kernel(x_ref,
                w1_ref, b1_ref,
                w2_ref, b2_ref,
                w3_ref, b3_ref,
                w4_ref, b4_ref,
                latent_ref, recon_ref):
    bf16 = jnp.bfloat16
    x = x_ref[...]                                                  # (tm, d0) bf16

    # Encoder: Linear(d0, d1) + ReLU
    h1 = jnp.dot(x, w1_ref[...], preferred_element_type=jnp.float32) + b1_ref[...]
    h1 = jnp.maximum(h1, 0.0)

    # Encoder: Linear(d1, d2) -> latent (pre-activation, as in the PyTorch module)
    h2 = jnp.dot(h1.astype(bf16), w2_ref[...],
                 preferred_element_type=jnp.float32) + b2_ref[...]
    latent_ref[...] = h2.astype(latent_ref.dtype)

    # Decoder: Linear(d2, d1) + ReLU
    h3 = jnp.dot(h2.astype(bf16), w3_ref[...],
                 preferred_element_type=jnp.float32) + b3_ref[...]
    h3 = jnp.maximum(h3, 0.0)

    # Decoder: Linear(d1, d0) + Sigmoid -> reconstruction (stored bf16)
    h4 = jnp.dot(h3.astype(bf16), w4_ref[...],
                 preferred_element_type=jnp.float32) + b4_ref[...]
    recon = pl.reciprocal(1.0 + jnp.exp(-h4), approx=True)         # sigmoid via EUP
    recon_ref[...] = recon.astype(recon_ref.dtype)


def _round_up(x, m):
    return ((x + m - 1) // m) * m


def _choose_tile(n, target=512):
    """tm ~= n / ceil(n / target), multiple of 8 -> minimal padding, big tiles."""
    num_steps = max(1, -(-n // target))
    tm = _round_up(-(-n // num_steps), 8)
    return tm, tm * num_steps


def _vmem_budget_bytes(tm, d0, d1, d2):
    bf, f32 = 2, 4
    x_tiles = 2 * tm * d0 * bf                       # double-buffered input
    latent_tiles = 2 * tm * d2 * f32                 # double-buffered output
    recon_tiles = 2 * tm * d0 * bf                   # double-buffered output
    weights = (d0 * d1 + d1 * d2 + d2 * d1 + d1 * d0) * bf   # single-buffered
    biases = (2 * d1 + d2 + d0) * f32
    intermed = tm * (2 * d1 + d2 + d0) * f32         # h1..h4 worst-case spill
    footprint = x_tiles + latent_tiles + recon_tiles + weights + biases + intermed
    # Generous headroom for compiler scratch, capped well under v7x's 64 MiB/TC.
    return min(2 * footprint + (8 << 20), 56 << 20)


@functools.partial(jax.jit, static_argnames=("tm",))
def _sdne_call(x_pad, w1, b1, w2, b2, w3, b3, w4, b4, *, tm):
    n_pad, d0 = x_pad.shape
    d1 = w1.shape[1]
    d2 = w2.shape[1]

    # Constant (resident) blocks: full-array block, constant index_map,
    # single-buffered since they never change across grid steps.
    def resident(shape):
        return pl.BlockSpec(shape, lambda i: (0, 0), pipeline_mode=pl.Buffered(1))

    return pl.pallas_call(
        sdne_kernel,
        out_shape=(
            jax.ShapeDtypeStruct((n_pad, d2), jnp.float32),     # latent
            jax.ShapeDtypeStruct((n_pad, d0), jnp.bfloat16),    # reconstruction
        ),
        grid_spec=pltpu.PrefetchScalarGridSpec(
            num_scalar_prefetch=0,
            grid=(n_pad // tm,),
            in_specs=[
                pl.BlockSpec((tm, d0), lambda i: (i, 0)),       # x tile (pipelined)
                resident((d0, d1)), resident((1, d1)),          # layer 1
                resident((d1, d2)), resident((1, d2)),          # layer 2
                resident((d2, d1)), resident((1, d1)),          # layer 3
                resident((d1, d0)), resident((1, d0)),          # layer 4
            ],
            out_specs=[
                pl.BlockSpec((tm, d2), lambda i: (i, 0)),
                pl.BlockSpec((tm, d0), lambda i: (i, 0)),
            ],
        ),
        compiler_params=pltpu.CompilerParams(
            dimension_semantics=("parallel",),     # row-tile axis shards across v7x's 2 TCs
            vmem_limit_bytes=_vmem_budget_bytes(tm, d0, d1, d2),
        ),
    )(x_pad, w1, b1, w2, b2, w3, b3, w4, b4)


def prepare_params(params_f32):
    """One-time cast: weights -> bf16 (MXU operands / halved HBM fetch), biases f32."""
    bf16 = jnp.bfloat16
    return {k: (v.astype(bf16) if k.startswith("w") else v.astype(jnp.float32))
            for k, v in params_f32.items()}


def sdne_forward(G_0, kparams, *, tm=None):
    """G_0: [N, d0] (ideally already bf16). kparams: output of prepare_params()."""
    N, d0 = G_0.shape
    if tm is None:
        tm, n_pad = _choose_tile(N)
    else:
        tm = _round_up(tm, 8)
        n_pad = _round_up(N, tm)

    x = G_0 if G_0.dtype == jnp.bfloat16 else G_0.astype(jnp.bfloat16)
    if n_pad != N:
        # Padded rows compute sigmoid(b4) garbage; they are sliced off below and
        # must be masked if a fused-loss epilogue is ever added.
        x = jnp.pad(x, ((0, n_pad - N), (0, 0)))

    latent, recon = _sdne_call(
        x,
        kparams["w1"], kparams["b1"],
        kparams["w2"], kparams["b2"],
        kparams["w3"], kparams["b3"],
        kparams["w4"], kparams["b4"],
        tm=tm,
    )
    return latent[:N], recon[:N]


def init_params(key, d0, d1, d2):
    """Deterministic f32 init (PyTorch nn.Linear-style). Weights as [d_in, d_out]."""
    ks = jax.random.split(key, 8)

    def lin(kw, kb, din, dout):
        bound = 1.0 / jnp.sqrt(din)
        w = jax.random.uniform(kw, (din, dout), jnp.float32, -bound, bound)
        b = jax.random.uniform(kb, (1, dout), jnp.float32, -bound, bound)
        return w, b

    w1, b1 = lin(ks[0], ks[1], d0, d1)
    w2, b2 = lin(ks[2], ks[3], d1, d2)
    w3, b3 = lin(ks[4], ks[5], d2, d1)
    w4, b4 = lin(ks[6], ks[7], d1, d0)
    return dict(w1=w1, b1=b1, w2=w2, b2=b2, w3=w3, b3=b3, w4=w4, b4=b4)


def sdne_ref_f32(G_0, p):
    """True f32 reference matching the PyTorch module's forward semantics."""
    h1 = jnp.maximum(G_0 @ p["w1"] + p["b1"], 0.0)
    h2 = h1 @ p["w2"] + p["b2"]
    h3 = jnp.maximum(h2 @ p["w3"] + p["b3"], 0.0)
    h4 = jax.nn.sigmoid(h3 @ p["w4"] + p["b4"])
    return h2, h4


if __name__ == "__main__":
    d0, d1, d2 = 256, 128, 128   # SDNE layer sizes

    key = jax.random.PRNGKey(0)
    k_in, k_param = jax.random.split(key)
    params_f32 = init_params(k_param, d0, d1, d2)
    kparams = prepare_params(params_f32)        # one-time bf16 weight cast

    # N=16  -> single grid step (whole batch tile).
    # N=640 -> 2 steps of tm=320 (zero padding; >=2 steps feeds both v7x TCs).
    # N=1000-> 2 steps of tm=504 (8 padded rows, ~0.8% waste).
    for N in (16, 640, 1000):
        G_0 = jax.random.uniform(jax.random.fold_in(k_in, N), (N, d0), jnp.float32)
        G_0_bf16 = G_0.astype(jnp.bfloat16)      # cast once, outside the kernel call

        latent, recon = sdne_forward(G_0_bf16, kparams)
        jax.block_until_ready((latent, recon))

        lat_ref, rec_ref = sdne_ref_f32(G_0, params_f32)
        assert latent.shape == (N, d2) and recon.shape == (N, d0)
        assert jnp.allclose(latent, lat_ref, atol=3e-2, rtol=3e-2), \
            f"latent mismatch at N={N}: max err " \
            f"{float(jnp.max(jnp.abs(latent - lat_ref)))}"
        assert jnp.allclose(recon.astype(jnp.float32), rec_ref, atol=3e-2, rtol=3e-2), \
            f"recon mismatch at N={N}: max err " \
            f"{float(jnp.max(jnp.abs(recon.astype(jnp.float32) - rec_ref)))}"

    print("KERNEL_OK")
</pallas_src>

<mosaic_0001>
module attributes {stable_mosaic.version = 11 : i64} {
  func.func @sdne_kernel(%arg0: i32, %arg1: memref<16x256xbf16, #tpu.memory_space<vmem>>, %arg2: memref<256x128xbf16, #tpu.memory_space<vmem>>, %arg3: memref<1x128xf32, #tpu.memory_space<vmem>>, %arg4: memref<128x128xbf16, #tpu.memory_space<vmem>>, %arg5: memref<1x128xf32, #tpu.memory_space<vmem>>, %arg6: memref<128x128xbf16, #tpu.memory_space<vmem>>, %arg7: memref<1x128xf32, #tpu.memory_space<vmem>>, %arg8: memref<128x256xbf16, #tpu.memory_space<vmem>>, %arg9: memref<1x256xf32, #tpu.memory_space<vmem>>, %arg10: memref<16x128xf32, #tpu.memory_space<vmem>>, %arg11: memref<16x256xbf16, #tpu.memory_space<vmem>>) attributes {dimension_semantics = [#tpu.dimension_semantics<parallel>], iteration_bounds = array<i64: 1>, scalar_prefetch = 0 : i64, scratch_operands = 0 : i64, tpu.core_type = #tpu.core_type<tc>, window_params = [{transform_indices = @transform_0, window_bounds = array<i64: 16, 256>}, {pipeline_mode = #tpu.pipeline_mode<synchronous>, transform_indices = @transform_1, window_bounds = array<i64: 256, 128>}, {pipeline_mode = #tpu.pipeline_mode<synchronous>, transform_indices = @transform_2, window_bounds = array<i64: 1, 128>}, {pipeline_mode = #tpu.pipeline_mode<synchronous>, transform_indices = @transform_3, window_bounds = array<i64: 128, 128>}, {pipeline_mode = #tpu.pipeline_mode<synchronous>, transform_indices = @transform_4, window_bounds = array<i64: 1, 128>}, {pipeline_mode = #tpu.pipeline_mode<synchronous>, transform_indices = @transform_5, window_bounds = array<i64: 128, 128>}, {pipeline_mode = #tpu.pipeline_mode<synchronous>, transform_indices = @transform_6, window_bounds = array<i64: 1, 128>}, {pipeline_mode = #tpu.pipeline_mode<synchronous>, transform_indices = @transform_7, window_bounds = array<i64: 128, 256>}, {pipeline_mode = #tpu.pipeline_mode<synchronous>, transform_indices = @transform_8, window_bounds = array<i64: 1, 256>}, {transform_indices = @transform_9, window_bounds = array<i64: 16, 128>}, {transform_indices = @transform_10, window_bounds = array<i64: 16, 256>}]} {
    %c0 = arith.constant 0 : index
    %c0_0 = arith.constant 0 : index
    %0 = vector.load %arg1[%c0, %c0_0] : memref<16x256xbf16, #tpu.memory_space<vmem>>, vector<16x256xbf16>
    %c0_1 = arith.constant 0 : index
    %c0_2 = arith.constant 0 : index
    %1 = vector.load %arg2[%c0_1, %c0_2] : memref<256x128xbf16, #tpu.memory_space<vmem>>, vector<256x128xbf16>
    %cst = arith.constant dense<0.000000e+00> : vector<16x128xf32>
    %2 = tpu.matmul %0, %1, %cst {dimension_numbers = #tpu.dot_dimension_numbers<[1], [0], [0], [1], [0, 0, 1, 1], [], []>} : vector<16x256xbf16>, vector<256x128xbf16>, vector<16x128xf32> -> vector<16x128xf32>
    %c0_3 = arith.constant 0 : index
    %c0_4 = arith.constant 0 : index
    %3 = vector.load %arg3[%c0_3, %c0_4] : memref<1x128xf32, #tpu.memory_space<vmem>>, vector<1x128xf32>
    %4 = vector.broadcast %3 : vector<1x128xf32> to vector<16x128xf32>
    %5 = arith.addf %2, %4 : vector<16x128xf32>
    %cst_5 = arith.constant 0.000000e+00 : f32
    %6 = vector.broadcast %cst_5 : f32 to vector<16x128xf32>
    %7 = arith.maximumf %5, %6 : vector<16x128xf32>
    %8 = arith.truncf %7 : vector<16x128xf32> to vector<16x128xbf16>
    %c0_6 = arith.constant 0 : index
    %c0_7 = arith.constant 0 : index
    %9 = vector.load %arg4[%c0_6, %c0_7] : memref<128x128xbf16, #tpu.memory_space<vmem>>, vector<128x128xbf16>
    %cst_8 = arith.constant dense<0.000000e+00> : vector<16x128xf32>
    %10 = tpu.matmul %8, %9, %cst_8 {dimension_numbers = #tpu.dot_dimension_numbers<[1], [0], [0], [1], [0, 0, 1, 1], [], []>} : vector<16x128xbf16>, vector<128x128xbf16>, vector<16x128xf32> -> vector<16x128xf32>
    %c0_9 = arith.constant 0 : index
    %c0_10 = arith.constant 0 : index
    %11 = vector.load %arg5[%c0_9, %c0_10] : memref<1x128xf32, #tpu.memory_space<vmem>>, vector<1x128xf32>
    %12 = vector.broadcast %11 : vector<1x128xf32> to vector<16x128xf32>
    %13 = arith.addf %10, %12 : vector<16x128xf32>
    %c0_11 = arith.constant 0 : index
    %c0_12 = arith.constant 0 : index
    %14 = vector.load %arg10[%c0_11, %c0_12] : memref<16x128xf32, #tpu.memory_space<vmem>>, vector<16x128xf32>
    tpu.vector_store %arg10[%c0_11, %c0_12], %13 {strides = array<i32>} : memref<16x128xf32, #tpu.memory_space<vmem>>, vector<16x128xf32>,
    %15 = arith.truncf %13 : vector<16x128xf32> to vector<16x128xbf16>
    %c0_13 = arith.constant 0 : index
    %c0_14 = arith.constant 0 : index
    %16 = vector.load %arg6[%c0_13, %c0_14] : memref<128x128xbf16, #tpu.memory_space<vmem>>, vector<128x128xbf16>
    %cst_15 = arith.constant dense<0.000000e+00> : vector<16x128xf32>
    %17 = tpu.matmul %15, %16, %cst_15 {dimension_numbers = #tpu.dot_dimension_numbers<[1], [0], [0], [1], [0, 0, 1, 1], [], []>} : vector<16x128xbf16>, vector<128x128xbf16>, vector<16x128xf32> -> vector<16x128xf32>
    %c0_16 = arith.constant 0 : index
    %c0_17 = arith.constant 0 : index
    %18 = vector.load %arg7[%c0_16, %c0_17] : memref<1x128xf32, #tpu.memory_space<vmem>>, vector<1x128xf32>
    %19 = vector.broadcast %18 : vector<1x128xf32> to vector<16x128xf32>
    %20 = arith.addf %17, %19 : vector<16x128xf32>
    %cst_18 = arith.constant 0.000000e+00 : f32
    %21 = vector.broadcast %cst_18 : f32 to vector<16x128xf32>
    %22 = arith.maximumf %20, %21 : vector<16x128xf32>
    %23 = arith.truncf %22 : vector<16x128xf32> to vector<16x128xbf16>
    %c0_19 = arith.constant 0 : index
    %c0_20 = arith.constant 0 : index
    %24 = vector.load %arg8[%c0_19, %c0_20] : memref<128x256xbf16, #tpu.memory_space<vmem>>, vector<128x256xbf16>
    %cst_21 = arith.constant dense<0.000000e+00> : vector<16x256xf32>
    %25 = tpu.matmul %23, %24, %cst_21 {dimension_numbers = #tpu.dot_dimension_numbers<[1], [0], [0], [1], [0, 0, 1, 1], [], []>} : vector<16x128xbf16>, vector<128x256xbf16>, vector<16x256xf32> -> vector<16x256xf32>
    %c0_22 = arith.constant 0 : index
    %c0_23 = arith.constant 0 : index
    %26 = vector.load %arg9[%c0_22, %c0_23] : memref<1x256xf32, #tpu.memory_space<vmem>>, vector<1x256xf32>
    %27 = vector.broadcast %26 : vector<1x256xf32> to vector<16x256xf32>
    %28 = arith.addf %25, %27 : vector<16x256xf32>
    %cst_24 = arith.constant 0.000000e+00 : f32
    %29 = vector.broadcast %cst_24 : f32 to vector<16x256xf32>
    %30 = arith.subf %29, %28 : vector<16x256xf32>
    %31 = math.exp %30 : vector<16x256xf32>
    %cst_25 = arith.constant 1.000000e+00 : f32
    %32 = vector.broadcast %cst_25 : f32 to vector<16x256xf32>
    %33 = arith.addf %32, %31 : vector<16x256xf32>
    %34 = tpu.reciprocal %33 {approx = true} : vector<16x256xf32> -> vector<16x256xf32>
    %35 = arith.truncf %34 : vector<16x256xf32> to vector<16x256xbf16>
    %c0_26 = arith.constant 0 : index
    %c0_27 = arith.constant 0 : index
    %36 = vector.load %arg11[%c0_26, %c0_27] : memref<16x256xbf16, #tpu.memory_space<vmem>>, vector<16x256xbf16>
    tpu.vector_store %arg11[%c0_26, %c0_27], %35 {strides = array<i32>} : memref<16x256xbf16, #tpu.memory_space<vmem>>, vector<16x256xbf16>,
    return
  }
  func.func @transform_0(%arg0: i32) -> (i32, i32) {
    %c0_i32 = arith.constant 0 : i32
    %c0_i32_0 = arith.constant 0 : i32
    return %arg0, %c0_i32 : i32, i32
  }
  func.func @transform_1(%arg0: i32) -> (i32, i32) {
    %c0_i32 = arith.constant 0 : i32
    %c0_i32_0 = arith.constant 0 : i32
    %c0_i32_1 = arith.constant 0 : i32
    return %c0_i32, %c0_i32_0 : i32, i32
  }
  func.func @transform_2(%arg0: i32) -> (i32, i32) {
    %c0_i32 = arith.constant 0 : i32
    %c0_i32_0 = arith.constant 0 : i32
    %c0_i32_1 = arith.constant 0 : i32
    return %c0_i32, %c0_i32_0 : i32, i32
  }
  func.func @transform_3(%arg0: i32) -> (i32, i32) {
    %c0_i32 = arith.constant 0 : i32
    %c0_i32_0 = arith.constant 0 : i32
    %c0_i32_1 = arith.constant 0 : i32
    return %c0_i32, %c0_i32_0 : i32, i32
  }
  func.func @transform_4(%arg0: i32) -> (i32, i32) {
    %c0_i32 = arith.constant 0 : i32
    %c0_i32_0 = arith.constant 0 : i32
    %c0_i32_1 = arith.constant 0 : i32
    return %c0_i32, %c0_i32_0 : i32, i32
  }
  func.func @transform_5(%arg0: i32) -> (i32, i32) {
    %c0_i32 = arith.constant 0 : i32
    %c0_i32_0 = arith.constant 0 : i32
    %c0_i32_1 = arith.constant 0 : i32
    return %c0_i32, %c0_i32_0 : i32, i32
  }
  func.func @transform_6(%arg0: i32) -> (i32, i32) {
    %c0_i32 = arith.constant 0 : i32
    %c0_i32_0 = arith.constant 0 : i32
    %c0_i32_1 = arith.constant 0 : i32
    return %c0_i32, %c0_i32_0 : i32, i32
  }
  func.func @transform_7(%arg0: i32) -> (i32, i32) {
    %c0_i32 = arith.constant 0 : i32
    %c0_i32_0 = arith.constant 0 : i32
    %c0_i32_1 = arith.constant 0 : i32
    return %c0_i32, %c0_i32_0 : i32, i32
  }
  func.func @transform_8(%arg0: i32) -> (i32, i32) {
    %c0_i32 = arith.constant 0 : i32
    %c0_i32_0 = arith.constant 0 : i32
    %c0_i32_1 = arith.constant 0 : i32
    return %c0_i32, %c0_i32_0 : i32, i32
  }
  func.func @transform_9(%arg0: i32) -> (i32, i32) {
    %c0_i32 = arith.constant 0 : i32
    %c0_i32_0 = arith.constant 0 : i32
    return %arg0, %c0_i32 : i32, i32
  }
  func.func @transform_10(%arg0: i32) -> (i32, i32) {
    %c0_i32 = arith.constant 0 : i32
    %c0_i32_0 = arith.constant 0 : i32
    return %arg0, %c0_i32 : i32, i32
  }
}

</mosaic_0001>

<bundles_post_ra>
// kernel: _sdne_call.1
= control target key start
LH: loop header
LB: loop body
LE: loop exit
PB: predicated region body
PF: predicated region fallthrough
CT: control target
= control target key end

     0   :  { %16 = vsyncpa [#allocation3], 0  ;;  %s1263_s0 = inlined_call_operand.hbm [shape: bf16[16,256], index: 0, kind: input, shape index: {}]   ;;  %s1264_s1 = inlined_call_operand.hbm [shape: bf16[256,128], index: 1, kind: input, shape index: {}]   ;;  %s1265_s2 = inlined_call_operand.vmem [shape: f32[1,128], index: 2, kind: input, shape index: {}]   ;;  %s1266_s3 = inlined_call_operand.hbm [shape: bf16[128,128], index: 3, kind: input, shape index: {}]   ;;  %s1267_s4 = inlined_call_operand.vmem [shape: f32[1,128], index: 4, kind: input, shape index: {}]   ;;  %s1268_s5 = inlined_call_operand.hbm [shape: bf16[128,128], index: 5, kind: input, shape index: {}]   ;;  %s1269_s6 = inlined_call_operand.vmem [shape: f32[1,128], index: 6, kind: input, shape index: {}]   ;;  %s1270_s7 = inlined_call_operand.hbm [shape: bf16[128,256], index: 7, kind: input, shape index: {}]   ;;  %s1271_s8 = inlined_call_operand.vmem [shape: f32[1,256], index: 8, kind: input, shape index: {}]   ;;  %s1272_s9 = inlined_call_operand.hbm [shape: f32[16,128], index: 9, kind: output, shape index: {0}]   ;;  %s1273_s10 = inlined_call_operand.hbm [shape: bf16[16,256], index: 10, kind: output, shape index: {1}]  }
   0x1   :  { %17 = vsyncpa [#allocation6], 0 }
   0x2   :  { %18 = vsyncpa [#allocation9], 0 }
   0x3   :  { %19 = vsyncpa [#allocation4], 0 }
   0x4   :  { %20 = vsyncpa [#allocation13], 0  ;;  %s1122_s13 = smov [#allocation5]  }
   0x5   :  { %s38_s14 = sshll.u32 %s1122_s13, 4  ;;  %s39_s14 = int_to_ptr.vmem [resolvable:$true] %s38_s14 }
   0x6   :  { %s980_s15 = scalar_lea.vmem %s39_s14, 2048  ;;  %p985_p1 = scmp.lt.s32.totalorder %s39_s14, %s39_s14 }
   0x7   :  { %p981_p0 = scmp.ne.s32.totalorder %s39_s14, %s980_s15  ;;  %p986_p2 = scmp.lt.s32.totalorder %s980_s15, %s980_s15 }
   0x9   :  { %p987_p3 = por %p986_p2, %p985_p1 }
   0xb   :  { %p988_p4 = pnand %p987_p3, %p981_p0 }
   0xd   :  { %991 = shalt.err (!%p988_p4)
}
   0xe   :  { %s1123_s16 = smov 64   ;;  %s1124_s17 = smov 4  }
   0xf   :  { %44 = dma.hbm_to_vmem [thread:$0]  %s1264_s1, 2048, %s39_s14, [#allocation6], %s1123_s16, %s1123_s16, %s1124_s17  }
  0x10   :  { %s1125_s20 = smov [#allocation8]   ;;  %s1126_s22 = smov [#allocation2]  }
  0x11   :  { %s66_s21 = sshll.u32 %s1125_s20, 4  ;;  %s26_s23 = sshll.u32 %s1126_s22, 4  ;;  %s67_s21 = int_to_ptr.vmem [resolvable:$true] %s66_s21  ;;  %s27_s23 = int_to_ptr.vmem [resolvable:$true] %s26_s23 }
  0x12   :  { %s1000_s24 = scalar_lea.vmem %s67_s21, 1024  ;;  %p1005_p6 = scmp.lt.s32.totalorder %s67_s21, %s67_s21 }
  0x13   :  { %p1001_p5 = scmp.ne.s32.totalorder %s67_s21, %s1000_s24  ;;  %p1006_p7 = scmp.lt.s32.totalorder %s1000_s24, %s1000_s24 }
  0x15   :  { %p1007_p8 = por %p1006_p7, %p1005_p6 }
  0x17   :  { %p1008_p9 = pnand %p1007_p8, %p1001_p5 }
  0x19   :  { %1011 = shalt.err (!%p1008_p9)
}
  0x1a   :  { %72 = dma.hbm_to_vmem [thread:$0]  %s1268_s5, 1024, %s67_s21, [#allocation9], %s1123_s16, %s1123_s16, %s1124_s17  }
  0x1b   :  { %s1020_s1 = scalar_lea.vmem %s27_s23, 256  ;;  %p1025_p11 = scmp.lt.s32.totalorder %s27_s23, %s27_s23 }
  0x1c   :  { %p1021_p10 = scmp.ne.s32.totalorder %s27_s23, %s1020_s1  ;;  %p1026_p12 = scmp.lt.s32.totalorder %s1020_s1, %s1020_s1 }
  0x1e   :  { %p1027_p13 = por %p1026_p12, %p1025_p11 }
  0x20   :  { %p1028_p0 = pnand %p1027_p13, %p1021_p10 }
  0x22   :  { %1031 = shalt.err (!%p1028_p0)
}
  0x23   :  { %s1127_s27 = smov 128   ;;  %s1128_s28 = smov 8  }
  0x24   :  { %32 = dma.hbm_to_vmem [thread:$0]  %s1263_s0, 256, %s27_s23, [#allocation3], %s1127_s27, %s1127_s27, %s1128_s28  }
  0x25   :  { %s1129_s11 = smov [#allocation7]   ;;  %s1130_s5 = smov [#allocation10]  }
  0x26   :  { %s52_s12 = sshll.u32 %s1129_s11, 4  ;;  %s80_s13 = sshll.u32 %s1130_s5, 4  ;;  %s53_s12 = int_to_ptr.vmem [resolvable:$true] %s52_s12  ;;  %s81_s13 = int_to_ptr.vmem [resolvable:$true] %s80_s13 }
  0x27   :  { %s1040_s14 = scalar_lea.vmem %s53_s12, 1024  ;;  %p1045_p2 = scmp.lt.s32.totalorder %s53_s12, %s53_s12 }
  0x28   :  { %p1041_p1 = scmp.ne.s32.totalorder %s53_s12, %s1040_s14  ;;  %p1046_p3 = scmp.lt.s32.totalorder %s1040_s14, %s1040_s14 }
  0x2a   :  { %p1047_p4 = por %p1046_p3, %p1045_p2 }
  0x2c   :  { %p1048_p5 = pnand %p1047_p4, %p1041_p1 }
  0x2e   :  { %1051 = shalt.err (!%p1048_p5)
}
  0x2f   :  { %58 = dma.hbm_to_vmem [thread:$0]  %s1266_s3, 1024, %s53_s12, [#allocation6], %s1123_s16, %s1123_s16, %s1124_s17  }
  0x30   :  { %s1060_s0 = scalar_lea.vmem %s81_s13, 2048  ;;  %p1065_p7 = scmp.lt.s32.totalorder %s81_s13, %s81_s13 }
  0x31   :  { %p1061_p6 = scmp.ne.s32.totalorder %s81_s13, %s1060_s0  ;;  %p1066_p8 = scmp.lt.s32.totalorder %s1060_s0, %s1060_s0 }
  0x33   :  { %p1067_p9 = por %p1066_p8, %p1065_p7 }
  0x35   :  { %p1068_p10 = pnand %p1067_p9, %p1061_p6 }
  0x37   :  { %1071 = shalt.err (!%p1068_p10)
}
  0x38   :  { %86 = dma.hbm_to_vmem [thread:$0]  %s1270_s7, 2048, %s81_s13, [#allocation9], %s1127_s27, %s1127_s27, %s1128_s28  }
  0x39   :  { %1112 = dma.done.wait [#allocation3], 256  }
  0x3a   :  { %1113 = vsyncadd [#allocation3], 4294967040 }
  0x3b   :  { %1114 = dma.done.wait [#allocation6], 3072  }
  0x3c   :  { %1115 = vsyncadd [#allocation6], 4294964224 }
  0x3d   :  { %1116 = dma.done.wait [#allocation9], 3072  }
  0x3e   :  { %1117 = vsyncadd [#allocation9], 4294964224  ;;  %v1131_v0 = vmov 0.0   ;;  %v897_v1 = vld [vmem:[#allocation5 + $0x78] sm:$0xff]   ;;  %v899_v3 = vld [vmem:[#allocation5 + $0x70] sm:$0xff]   ;;  %vm1132_vm0 = vmmov 0  }
  0x3f   :  { %843 = vmatprep.subr.bf16.mxu1 %v1131_v0  ;;  %v898_v2 = vld [vmem:[#allocation5 + $0x38] sm:$0xff]   ;;  %803 = vmatprep.subr.bf16.mxu0 %v897_v1  ;;  %v900_v4 = vld [vmem:[#allocation5 + $0x30] sm:$0xff]   ;;  %v901_v5 = vld [vmem:[#allocation5 + $0x68] sm:$0xff]   ;;  %s1134_s21 = smov [#allocation11]  }
  0x40   :  { %804 = vmatpush3.bf16.msra.mxu0 %v898_v2  ;;  %v902_v6 = vld [vmem:[#allocation5 + $0x28] sm:$0xff]   ;;  %v903_v7 = vld [vmem:[#allocation5 + $0x60] sm:$0xff]   ;;  %v905_v9 = vld [vmem:[#allocation5 + $0x58] sm:$0xff]   ;;  %859 = vmatprep.mubr.msk.bf16.mxu1 %vm1132_vm0, %v1131_v0  ;;  %s716_s22 = sshll.u32 %s1134_s21, 4  ;;  %s717_s22 = int_to_ptr.vmem [resolvable:$true] %s716_s22 }
  0x41   :  { %805 = vmatprep.subr.bf16.mxu0 %v899_v3  ;;  %v904_v8 = vld [vmem:[#allocation5 + $0x20] sm:$0xff]   ;;  %v906_v10 = vld [vmem:[#allocation5 + $0x18] sm:$0xff]   ;;  %v907_v11 = vld [vmem:[#allocation5 + $0x50] sm:$0xff]   ;;  %s1072_s23 = scalar_lea.vmem %s717_s22, 256  ;;  %p1077_p12 = scmp.lt.s32.totalorder %s717_s22, %s717_s22 }
  0x42   :  { %v908_v12 = vld [vmem:[#allocation5 + $0x10] sm:$0xff]   ;;  %v916_v14 = vld [vmem:[#allocation7 + $0x38] sm:$0xff]   ;;  %v909_v15 = vld [vmem:[#allocation5 + $0x48] sm:$0xff]   ;;  %p1073_p11 = scmp.ne.s32.totalorder %s717_s22, %s1072_s23  ;;  %p1078_p13 = scmp.lt.s32.totalorder %s1072_s23, %s1072_s23 }
  0x43   :  { %v915_v13 = vld [vmem:[#allocation2 + $0x4] ss:$8 sps:$4 sm:$0xff]   ;;  %844 = vmatpush3.bf16.msra.mxu1 %v916_v14  ;;  %v910_v17 = vld [vmem:[#allocation5 + $0x8] sm:$0xff]   ;;  %v911_v18 = vld [vmem:[#allocation5 + $0x40] sm:$0xff]  }
  0x44   :  { %806 = vmatpush3.bf16.msra.mxu0 %v900_v4  ;;  %284 = vmatprep.mubr.bf16.mxu0 %v915_v13  ;;  %v917_v16 = vld [vmem:[#allocation7 + $0x30] sm:$0xff]   ;;  %v918_v19 = vld [vmem:[#allocation7 + $0x28] sm:$0xff]   ;;  %v912_v20 = vld [vmem:[#allocation5] sm:$0xff]   ;;  %p1079_p0 = por %p1078_p13, %p1077_p12 }
  0x45   :  { %807 = vmatprep.subr.bf16.mxu0 %v901_v5  ;;  %845 = vmatprep.subr.bf16.mxu1 %v1131_v0  ;;  %v919_v21 = vld [vmem:[#allocation7 + $0x20] sm:$0xff]   ;;  %v913_v22 = vld [vmem:[#allocation2] ss:$8 sps:$4 sm:$0xff]   ;;  %v922_v25 = vld [vmem:[#allocation7 + $0x8] sm:$0xff]  }
  0x46   :  { %v920_v23 = vld [vmem:[#allocation7 + $0x18] sm:$0xff]   ;;  %v921_v24 = vld [vmem:[#allocation7 + $0x10] sm:$0xff]   ;;  %v923_v26 = vld [vmem:[#allocation7] sm:$0xff]   ;;  %p1080_p1 = pnand %p1079_p0, %p1073_p11 }
  0x47   :  { %846 = vmatpush3.bf16.msra.mxu1 %v917_v16  ;;  %v924_v27 = vld [vmem:[#allocation8 + $0x38] sm:$0xff]   ;;  %v925_v28 = vld [vmem:[#allocation8 + $0x30] sm:$0xff]   ;;  %v926_v29 = vld [vmem:[#allocation8 + $0x28] sm:$0xff]  }
  0x48   :  { %808 = vmatpush3.bf16.msra.mxu0 %v902_v6  ;;  %847 = vmatprep.subr.bf16.mxu1 %v1131_v0  ;;  %v927_v30 = vld [vmem:[#allocation8 + $0x20] sm:$0xff]   ;;  %v928_v31 = vld [vmem:[#allocation8 + $0x18] sm:$0xff]   ;;  %v929_v32 = vld [vmem:[#allocation8 + $0x10] sm:$0xff]  }
  0x49   :  { %809 = vmatprep.subr.bf16.mxu0 %v903_v7  ;;  %v746_v36 = vld [vmem:[%s1265_s2] ss:$0 sm:$0xff]  ;;  %v930_v45 = vld [vmem:[#allocation8 + $0x8] sm:$0xff]   ;;  %v931_v46 = vld [vmem:[#allocation8] sm:$0xff]   ;;  %v1133_v7 = vmov 0  }
  0x4a   :  { %v932_v47 = vld [vmem:[#allocation10 + $0x70] ss:$8 sps:$4 sm:$0xff]   ;;  %v934_v48 = vld [vmem:[#allocation10 + $0x74] ss:$8 sps:$4 sm:$0xff]   ;;  %v937_v49 = vld [vmem:[#allocation10 + $0x64] ss:$8 sps:$4 sm:$0xff]  }
  0x4b   :  { %848 = vmatpush3.bf16.msra.mxu1 %v918_v19  ;;  %v935_v50 = vld [vmem:[#allocation10 + $0x60] ss:$8 sps:$4 sm:$0xff]   ;;  %v940_v51 = vld [vmem:[#allocation10 + $0x54] ss:$8 sps:$4 sm:$0xff]   ;;  %v938_v52 = vld [vmem:[#allocation10 + $0x50] ss:$8 sps:$4 sm:$0xff]  }
  0x4c   :  { %810 = vmatpush3.bf16.msra.mxu0 %v904_v8  ;;  %849 = vmatprep.subr.bf16.mxu1 %v1131_v0  ;;  %v943_v53 = vld [vmem:[#allocation10 + $0x44] ss:$8 sps:$4 sm:$0xff]   ;;  %v941_v54 = vld [vmem:[#allocation10 + $0x40] ss:$8 sps:$4 sm:$0xff]   ;;  %v946_v55 = vld [vmem:[#allocation10 + $0x34] ss:$8 sps:$4 sm:$0xff]  }
  0x4d   :  { %811 = vmatprep.subr.bf16.mxu0 %v905_v9  ;;  %v944_v56 = vld [vmem:[#allocation10 + $0x30] ss:$8 sps:$4 sm:$0xff]   ;;  %v949_v57 = vld [vmem:[#allocation10 + $0x24] ss:$8 sps:$4 sm:$0xff]   ;;  %v947_v58 = vld [vmem:[#allocation10 + $0x20] ss:$8 sps:$4 sm:$0xff]  }
  0x4e   :  { %v765_v59 = vld [vmem:[%s1267_s4] ss:$0 sm:$0xff]  ;;  %v952_v3 = vld [vmem:[#allocation10 + $0x14] ss:$8 sps:$4 sm:$0xff]   ;;  %v955_v5 = vld [vmem:[#allocation10 + $0x4] ss:$8 sps:$4 sm:$0xff]  }
  0x4f   :  { %850 = vmatpush3.bf16.msra.mxu1 %v919_v21  ;;  %v950_v4 = vld [vmem:[#allocation10 + $0x10] ss:$8 sps:$4 sm:$0xff]   ;;  %v953_v6 = vld [vmem:[#allocation10] ss:$8 sps:$4 sm:$0xff]  }
  0x50   :  { %812 = vmatpush3.bf16.msra.mxu0 %v906_v10  ;;  %851 = vmatprep.subr.bf16.mxu1 %v1131_v0  ;;  %v774_v8 = vld [vmem:[%s1269_s6] ss:$0 sm:$0xff] }
  0x51   :  { %813 = vmatprep.subr.bf16.mxu0 %v907_v11 }
  0x53   :  { %852 = vmatpush3.bf16.msra.mxu1 %v920_v23 }
  0x54   :  { %814 = vmatpush3.bf16.msra.mxu0 %v908_v12  ;;  %853 = vmatprep.subr.bf16.mxu1 %v1131_v0 }
  0x55   :  { %815 = vmatprep.subr.bf16.mxu0 %v909_v15 }
  0x57   :  { %854 = vmatpush3.bf16.msra.mxu1 %v921_v24 }
  0x58   :  { %816 = vmatpush3.bf16.msra.mxu0 %v910_v17  ;;  %855 = vmatprep.subr.bf16.mxu1 %v1131_v0 }
  0x59   :  { %817 = vmatprep.subr.bf16.mxu0 %v911_v18 }
  0x5b   :  { %856 = vmatpush3.bf16.msra.mxu1 %v922_v25 }
  0x5c   :  { %818 = vmatpush3.bf16.msra.mxu0 %v912_v20  ;;  %857 = vmatprep.subr.bf16.mxu1 %v1131_v0 }
  0x5d   :  { %863 = vmatprep.subr.bf16.mxu0 %v1131_v0 }
  0x5f   :  { %285 = vmatmul.mubr.bf16.vlgmr.msra.gmra.mxu0 %v913_v22  ;;  %858 = vmatpush3.bf16.msra.mxu1 %v923_v26 }
  0x60   :  { %879 = vmatprep.mubr.msk.bf16.mxu0 %vm1132_vm0, %v1131_v0  ;;  %864 = vmatpush3.bf16.msra.mxu0 %v924_v27 }
  0x61   :  { %865 = vmatprep.subr.bf16.mxu0 %v1131_v0  ;;  %634 = vmatprep.subr.bf16.mxu1 %v934_v48 }
  0x64   :  { %866 = vmatpush3.bf16.msra.mxu0 %v925_v28 }
  0x65   :  { %867 = vmatprep.subr.bf16.mxu0 %v1131_v0 }
  0x68   :  { %868 = vmatpush3.bf16.msra.mxu0 %v926_v29 }
  0x69   :  { %869 = vmatprep.subr.bf16.mxu0 %v1131_v0 }
  0x6c   :  { %870 = vmatpush3.bf16.msra.mxu0 %v927_v30 }
  0x6d   :  { %871 = vmatprep.subr.bf16.mxu0 %v1131_v0 }
  0x70   :  { %872 = vmatpush3.bf16.msra.mxu0 %v928_v31 }
  0x71   :  { %873 = vmatprep.subr.bf16.mxu0 %v1131_v0 }
  0x74   :  { %874 = vmatpush3.bf16.msra.mxu0 %v929_v32 }
  0x75   :  { %875 = vmatprep.subr.bf16.mxu0 %v1131_v0 }
  0x78   :  { %876 = vmatpush3.bf16.msra.mxu0 %v930_v45 }
  0x79   :  { %877 = vmatprep.subr.bf16.mxu0 %v1131_v0 }
  0x7c   :  { %878 = vmatpush3.bf16.msra.mxu0 %v931_v46 }
 0x11f   :  { %v819_v33 = vpop.f32.mrf.mxu0 }
 0x121   :  { %v820_v34 = vpop.f32.mrf.mxu0 }
 0x122   :  { %v821_v35 = vadd.f32 %v820_v34, %v819_v33 }
 0x123   :  { %v822_v37 = vpop.f32.mrf.mxu0 }
 0x124   :  { %v287_v39 = vadd.f32 %v821_v35, %v746_v36 }
 0x125   :  { %v823_v38 = vpop.f32.mrf.mxu0 }
 0x126   :  { %v824_v40 = vadd.f32 %v823_v38, %v822_v37  ;;  %v293_v42 = vmax.f32 %v287_v39, 0.0 }
 0x128   :  { %v290_v41 = vadd.f32 %v824_v40, %v746_v36 }
 0x12a   :  { %v294_v43 = vmax.f32 %v290_v41, 0.0 }
 0x12c   :  { %v295_v44 = vpack.c.bf16 %v294_v43, %v293_v42 }
 0x12e   :  { %860 = vmatmul.mubr.bf16.vlgmr.msra.gmra.mxu1 %v295_v44 }
 0x12f   :  { %635 = vmatpush1.bf16.msra.mxu1 %v932_v47  ;;  %666 = vmatprep.mubr.bf16.mxu1 %v1133_v7 }
 0x130   :  { %636 = vmatprep.subr.bf16.mxu1 %v937_v49 }
 0x133   :  { %637 = vmatpush1.bf16.msra.mxu1 %v935_v50 }
 0x134   :  { %638 = vmatprep.subr.bf16.mxu1 %v940_v51 }
 0x137   :  { %639 = vmatpush1.bf16.msra.mxu1 %v938_v52 }
 0x138   :  { %640 = vmatprep.subr.bf16.mxu1 %v943_v53 }
 0x13b   :  { %641 = vmatpush1.bf16.msra.mxu1 %v941_v54 }
 0x13c   :  { %642 = vmatprep.subr.bf16.mxu1 %v946_v55 }
 0x13f   :  { %643 = vmatpush1.bf16.msra.mxu1 %v944_v56 }
 0x140   :  { %644 = vmatprep.subr.bf16.mxu1 %v949_v57 }
 0x143   :  { %645 = vmatpush1.bf16.msra.mxu1 %v947_v58 }
 0x144   :  { %646 = vmatprep.subr.bf16.mxu1 %v952_v3 }
 0x147   :  { %647 = vmatpush1.bf16.msra.mxu1 %v950_v4 }
 0x148   :  { %648 = vmatprep.subr.bf16.mxu1 %v955_v5 }
 0x14b   :  { %649 = vmatpush1.bf16.msra.mxu1 %v953_v6 }
 0x1ee   :  { %v401_v60 = vpop.f32.mrf.mxu1 }
 0x1ef   :  { %v402_v61 = vadd.f32 %v765_v59, %v401_v60 }
 0x1f0   :  { %v861_v62 = vpop.f32.mrf.mxu1 }
 0x1f1   :  { %408 = vst [vmem:[#allocation11] sm:$0xff] %v402_v61 }
 0x1f2   :  { %v404_v63 = vpop.f32.mrf.mxu1 }
 0x1f3   :  { %v405_v0 = vadd.f32 %v765_v59, %v404_v63 }
 0x1f4   :  { %v862_v1 = vpop.f32.mrf.mxu1 }
 0x1f5   :  { %409 = vst [vmem:[#allocation11 + $0x8] sm:$0xff] %v405_v0  ;;  %v410_v2 = vpack.c.bf16 %v405_v0, %v402_v61 }
 0x1f7   :  { %880 = vmatmul.mubr.bf16.vlgmr.msra.gmra.mxu0 %v410_v2 }
 0x2b7   :  { %v516_v9 = vpop.f32.mrf.mxu0 }
 0x2b8   :  { %v517_v11 = vadd.f32 %v774_v8, %v516_v9 }
 0x2b9   :  { %v881_v10 = vpop.f32.mrf.mxu0 }
 0x2ba   :  { %v523_v15 = vmax.f32 %v517_v11, 0.0 }
 0x2bb   :  { %v519_v12 = vpop.f32.mrf.mxu0 }
 0x2bc   :  { %v520_v13 = vadd.f32 %v774_v8, %v519_v12 }
 0x2bd   :  { %v882_v14 = vpop.f32.mrf.mxu0 }
 0x2be   :  { %v524_v16 = vmax.f32 %v520_v13, 0.0 }
 0x2c0   :  { %v525_v17 = vpack.c.bf16 %v524_v16, %v523_v15 }
 0x2c2   :  { %667 = vmatmul.mubr.bf16.vlgmr.msra.gmra.mxu1 %v525_v17 }
 0x2c3   :  { %1083 = shalt.err (!%p1080_p1)
}
 0x2c4   :  { %722 = dma.vmem_to_hbm [thread:$0]  %s717_s22, 256, %s1272_s9, [#allocation4], %s1127_s27, %s1127_s27, %s1128_s28   ;;  %v544_v18 = vlaneseq }
 0x2c5   :  { %v542_v21 = vld [vmem:[%s1271_s8] sm:$0x3]  ;;  %s1135_s8 = smov [#allocation12]  }
 0x2c6   :  { %v545_v19 = vshrl.u32 %v544_v18, 7  ;;  %s728_s9 = sshll.u32 %s1135_s8, 4  ;;  %s729_s9 = int_to_ptr.vmem [resolvable:$true] %s728_s9 }
 0x2c7   :  { %s1092_s1 = scalar_lea.vmem %s729_s9, 256  ;;  %p1097_p3 = scmp.lt.s32.totalorder %s729_s9, %s729_s9 }
 0x2c8   :  { %v546_v20 = vsub.s32 0, %v545_v19  ;;  %v550_v22 = vsub.s32 1, %v545_v19  ;;  %p1093_p2 = scmp.ne.s32.totalorder %s729_s9, %s1092_s1  ;;  %p1098_p4 = scmp.lt.s32.totalorder %s1092_s1, %s1092_s1 }
 0x2ca   :  { %v547_v23 = vrot.slane %v542_v21, %v546_v20  ;;  %v551_v24 = vrot.slane %v542_v21, %v550_v22  ;;  %p1099_p5 = por %p1098_p4, %p1097_p3 }
 0x2cc   :  { %p1100_p6 = pnand %p1099_p5, %p1093_p2 }
 0x382   :  { %v668_v25 = vpop.f32.mrf.mxu1 }
 0x383   :  { %v669_v26 = vadd.f32 %v668_v25, %v547_v23 }
 0x384   :  { %v670_v27 = vpop.f32.mrf.mxu1 }
 0x385   :  { %v677_v28 = vsub.f32 0.0, %v669_v26  ;;  %v671_v29 = vadd.f32 %v670_v27, %v551_v24 }
 0x386   :  { %v672_v30 = vpop.f32.mrf.mxu1 }
 0x387   :  { %v681_v31 = vmul.f32 1.442695, %v677_v28  ;;  %v678_v32 = vsub.f32 0.0, %v671_v29  ;;  %v673_v33 = vadd.f32 %v672_v30, %v547_v23 }
 0x388   :  { %v674_v34 = vpop.f32.mrf.mxu1 }
 0x389   :  { %956 = vpow2.f32 %v681_v31  ;;  %v683_v35 = vmul.f32 1.442695, %v678_v32  ;;  %v679_v36 = vsub.f32 0.0, %v673_v33  ;;  %v675_v37 = vadd.f32 %v674_v34, %v551_v24 }
 0x38b   :  { %958 = vpow2.f32 %v683_v35  ;;  %v685_v38 = vmul.f32 1.442695, %v679_v36  ;;  %v680_v39 = vsub.f32 0.0, %v675_v37 }
 0x38d   :  { %960 = vpow2.f32 %v685_v38  ;;  %v687_v40 = vmul.f32 1.442695, %v680_v39 }
 0x38f   :  { %962 = vpow2.f32 %v687_v40 }
 0x396   :  { %v957_v41 = vpop.eup %956 }
 0x397   :  { %v689_v42 = vadd.f32 1.0, %v957_v41 }
 0x398   :  { %v959_v43 = vpop.eup %958 }
 0x399   :  { %v690_v44 = vadd.f32 1.0, %v959_v43  ;;  %964 = vrcp.f32 %v689_v42 }
 0x39a   :  { %v961_v45 = vpop.eup %960 }
 0x39b   :  { %966 = vrcp.f32 %v690_v44  ;;  %v691_v46 = vadd.f32 1.0, %v961_v45 }
 0x39c   :  { %v963_v47 = vpop.eup %962 }
 0x39d   :  { %v692_v48 = vadd.f32 1.0, %v963_v47  ;;  %968 = vrcp.f32 %v691_v46 }
 0x39f   :  { %970 = vrcp.f32 %v692_v48 }
 0x3a6   :  { %v965_v49 = vpop.eup %964 }
 0x3a8   :  { %v967_v50 = vpop.eup %966 }
 0x3a9   :  { %v801_v51 = vpack.c.bf16 %v967_v50, %v965_v49 }
 0x3aa   :  { %v969_v52 = vpop.eup %968 }
 0x3ab   :  { %709 = vst [vmem:[#allocation12] sm:$0xff] %v801_v51 }
 0x3ac   :  { %v971_v53 = vpop.eup %970 }
 0x3ad   :  { %v802_v54 = vpack.c.bf16 %v971_v53, %v969_v52 }
 0x3af   :  { %710 = vst [vmem:[#allocation12 + $0x8] sm:$0xff] %v802_v54 }
 0x3b0   :  { %1103 = shalt.err (!%p1100_p6)
}
 0x3b1   :  { %734 = dma.vmem_to_hbm [thread:$0]  %s729_s9, 256, %s1273_s10, [#allocation13], %s1127_s27, %s1127_s27, %s1128_s28  }
 0x3b2   :  { %1118 = dma.done.wait [#allocation4], 256  }
 0x3b3   :  { %1119 = vsyncadd [#allocation4], 4294967040 }
 0x3b4   :  { %1120 = dma.done.wait [#allocation13], 256  }
 0x3b5   :  { %1121 = vsyncadd [#allocation13], 4294967040 }
 0x3b6   :  { %741 = vsyncpa [#allocation3], 1 }
 0x3b7   :  { %742 = vsyncpa [#allocation6], 1 }
 0x3b8   :  { %743 = vsyncpa [#allocation9], 1 }
 0x3b9   :  { %744 = vsyncpa [#allocation4], 1 }
 0x3ba   :  { %745 = vsyncpa [#allocation13], 1 }

</bundles_post_ra>
